<compile_context>
chip_gen: v6e
topology: v6e:2x2x1
jax: 0.10.0
libtpu: 0.0.40
codegen_flags: <defaults>
</compile_context>

<pallas_src>
import jax
import jax.numpy as jnp
import numpy as np
from jax import lax
from jax.experimental import pallas as pl
from jax.experimental.pallas import tpu as pltpu

LANE = 128


def _round_up(x, m):
    return ((x + m - 1) // m) * m


# ----------------------------- Pallas kernels -----------------------------

def qrnn_layer_kernel(x_ref, w_ref, b_ref, out_ref):
    """Fused causal-conv gates + f-pooling for a (Bblk, T) block.

    x_ref   : (Bblk, T, Din_p)   activations (bf16 or f32), lane-dense
    w_ref   : (K*Din_p, 2*H_p)   fused + tap-unfolded [Wz | Wf] weights
    b_ref   : (1, 2*H_p)         fused [bz | bf] bias (f32)
    out_ref : (Bblk, T, H_p)
    """
    Bblk, T, Din_p = x_ref.shape
    H_p = out_ref.shape[2]
    K = w_ref.shape[0] // Din_p

    x = x_ref[...]
    # Zero-padded causal buffer; K static slices build the unfolded (im2col)
    # input so the whole conv is a single MXU matmul.
    if K > 1:
        zpad = jnp.zeros((Bblk, K - 1, Din_p), x.dtype)
        xpad = jnp.concatenate([zpad, x], axis=1)           # (Bblk, T+K-1, Din_p)
    else:
        xpad = x
    xs = jnp.concatenate([xpad[:, j:j + T, :] for j in range(K)], axis=-1)
    xs2d = xs.reshape(Bblk * T, K * Din_p)

    # One matmul for both gates and all K taps, f32 accumulation.
    g = jnp.dot(xs2d, w_ref[...], preferred_element_type=jnp.float32)
    g = g + b_ref[...]                                      # (Bblk*T, 2*H_p)

    z = jnp.tanh(g[:, :H_p]).reshape(Bblk, T, H_p)
    f = jax.nn.sigmoid(g[:, H_p:]).reshape(Bblk, T, H_p)

    # f-pooling: h_t = f_t*h_{t-1} + (1-f_t)*z_t,  h_{-1} = 0.
    # First-order linear recurrence -> Kogge-Stone scan: ceil(log2 T) full-tile
    # VPU passes and a single lane-dense bulk store (no per-t masked stores).
    a = f                          # multiplicative term
    b = (1.0 - f) * z              # additive term; after the scan b[t] == h_t
    d = 1
    while d < T:
        a_sh = jnp.concatenate(
            [jnp.ones((Bblk, d, H_p), jnp.float32), a[:, :T - d, :]], axis=1)
        b_sh = jnp.concatenate(
            [jnp.zeros((Bblk, d, H_p), jnp.float32), b[:, :T - d, :]], axis=1)
        b = a * b_sh + b
        a = a * a_sh
        d *= 2

    out_ref[...] = b.astype(out_ref.dtype)


def linear_kernel(x_ref, w_ref, b_ref, out_ref):
    out_ref[...] = (
        jnp.dot(x_ref[...], w_ref[...], preferred_element_type=jnp.float32)
        + b_ref[...]
    ).astype(out_ref.dtype)


# ------------------------------ Wrappers -----------------------------------

def _batch_block(B):
    """Largest divisor of B that still leaves >= 2 grid steps (v7x: 2 TCs)."""
    if B < 2:
        return 1
    bblk = max(1, B // 2)
    while B % bblk:
        bblk -= 1
    return bblk


def qrnn_layer(x, w_fused, b_fused):
    B, T, Din_p = x.shape
    H_p = w_fused.shape[1] // 2
    Bblk = _batch_block(B)
    return pl.pallas_call(
        qrnn_layer_kernel,
        out_shape=jax.ShapeDtypeStruct((B, T, H_p), x.dtype),
        grid=(B // Bblk,),
        in_specs=[
            pl.BlockSpec((Bblk, T, Din_p), lambda i: (i, 0, 0)),
            pl.BlockSpec(w_fused.shape, lambda i: (0, 0)),
            pl.BlockSpec(b_fused.shape, lambda i: (0, 0)),
        ],
        out_specs=pl.BlockSpec((Bblk, T, H_p), lambda i: (i, 0, 0)),
        compiler_params=pltpu.CompilerParams(
            dimension_semantics=("parallel",)),
    )(x, w_fused, b_fused)


def classifier(x2d, w, b):
    """(N, H_p) @ (H_p, V_p) + b, row-tiled, lane-dense padded V."""
    N, H_p = x2d.shape
    V_p = w.shape[1]
    n_blk = 256 if N >= 256 else _round_up(N, 8)
    N_pad = _round_up(N, n_blk)
    if N_pad != N:
        x2d = jnp.pad(x2d, ((0, N_pad - N), (0, 0)))
    out = pl.pallas_call(
        linear_kernel,
        out_shape=jax.ShapeDtypeStruct((N_pad, V_p), jnp.float32),
        grid=(N_pad // n_blk,),
        in_specs=[
            pl.BlockSpec((n_blk, H_p), lambda i: (i, 0)),
            pl.BlockSpec((H_p, V_p), lambda i: (0, 0)),
            pl.BlockSpec((1, V_p), lambda i: (0, 0)),
        ],
        out_specs=pl.BlockSpec((n_blk, V_p), lambda i: (i, 0)),
        compiler_params=pltpu.CompilerParams(
            dimension_semantics=("parallel",)),
    )(x2d, w, b)
    return out[:N]


def prepare_params(params, matmul_dtype=jnp.bfloat16):
    """Pad channel dims to lane multiples, fuse z/f gates, unfold conv taps.

    Padding is numerically exact: padded weight rows/cols are zero, so padded
    activation channels stay exactly zero through every layer.
    """
    emb = params["embedding"]
    _, E = emb.shape
    E_p = _round_up(E, LANE)
    emb_p = jnp.pad(emb, ((0, 0), (0, E_p - E))).astype(matmul_dtype)

    layers = []
    din_p = E_p
    for lp in params["layers"]:
        wz, wf, bz, bf = lp["wz"], lp["wf"], lp["bz"], lp["bf"]
        K, din, H = wz.shape
        H_p = _round_up(H, LANE)
        d_p = _round_up(din, LANE)
        assert d_p == din_p
        wz_p = jnp.pad(wz, ((0, 0), (0, d_p - din), (0, H_p - H)))
        wf_p = jnp.pad(wf, ((0, 0), (0, d_p - din), (0, H_p - H)))
        # (K, Din_p, 2*H_p) -> (K*Din_p, 2*H_p); tap-major rows match the
        # in-kernel im2col concat order.
        w_fused = jnp.concatenate([wz_p, wf_p], axis=-1).reshape(K * d_p, 2 * H_p)
        b_fused = jnp.concatenate(
            [jnp.pad(bz, ((0, 0), (0, H_p - H))),
             jnp.pad(bf, ((0, 0), (0, H_p - H)))], axis=-1)
        layers.append(dict(w_fused=w_fused.astype(matmul_dtype),
                           b_fused=b_fused.astype(jnp.float32)))
        din_p = H_p

    w_cls, b_cls = params["w_cls"], params["b_cls"]
    H, V_out = w_cls.shape
    H_p = _round_up(H, LANE)
    V_p = _round_up(V_out, LANE)
    w_cls_p = jnp.pad(w_cls, ((0, H_p - H), (0, V_p - V_out))).astype(matmul_dtype)
    b_cls_p = jnp.pad(b_cls, ((0, 0), (0, V_p - V_out))).astype(jnp.float32)
    return dict(embedding=emb_p, layers=layers,
                w_cls=w_cls_p, b_cls=b_cls_p, vocab_out=V_out)


def qrnn_forward(prepped, inputs, lengths):
    # The PyTorch forward ignores `lengths` (no packing inside forward()).
    del lengths
    h = prepped["embedding"][inputs]          # gather: plain-JAX glue
    for lp in prepped["layers"]:
        h = qrnn_layer(h, lp["w_fused"], lp["b_fused"])
        # nn.Dropout(p=0.0) between layers -> identity
    B, T, H_p = h.shape
    logits_p = classifier(h.reshape(B * T, H_p), prepped["w_cls"], prepped["b_cls"])
    V = prepped["vocab_out"]
    return logits_p[:, :V].reshape(B, T, V)


# ------------------------- Pure-JAX f32 reference ---------------------------

def qrnn_layer_ref(x, wz, wf, bz, bf):
    B, T, _ = x.shape
    K, _, H = wz.shape
    gz = jnp.zeros((B, T, H), jnp.float32)
    gf = jnp.zeros((B, T, H), jnp.float32)
    for j in range(K):
        s = K - 1 - j
        xs = jnp.pad(x, ((0, 0), (s, 0), (0, 0)))[:, :T]
        gz = gz + jnp.einsum("btd,dh->bth", xs, wz[j])
        gf = gf + jnp.einsum("btd,dh->bth", xs, wf[j])
    z = jnp.tanh(gz + bz)
    f = jax.nn.sigmoid(gf + bf)

    def step(h, ft_zt):
        f_t, z_t = ft_zt
        h_new = f_t * h + (1.0 - f_t) * z_t
        return h_new, h_new

    _, hs = lax.scan(step, jnp.zeros((B, H), jnp.float32),
                     (jnp.swapaxes(f, 0, 1), jnp.swapaxes(z, 0, 1)))
    return jnp.swapaxes(hs, 0, 1)


def qrnn_forward_ref(params, inputs):
    h = params["embedding"][inputs]
    for lp in params["layers"]:
        h = qrnn_layer_ref(h, lp["wz"], lp["wf"], lp["bz"], lp["bf"])
    return jnp.einsum("bth,hv->btv", h, params["w_cls"]) + params["b_cls"][0]


# --------------------------------- Main -------------------------------------

if __name__ == "__main__":
    VOCAB, EMB, HID, K, NLAYERS = 16, 32, 32, 2, 2
    B, T = 2, 8

    key = jax.random.PRNGKey(0)
    keys = jax.random.split(key, 3 + 4 * NLAYERS)

    # Embedding (padding_idx=0 -> row 0 is zero)
    emb_tbl = 0.1 * jax.random.normal(keys[0], (VOCAB, EMB), jnp.float32)
    emb_tbl = emb_tbl.at[0].set(0.0)

    layers = []
    kidx = 1
    for l in range(NLAYERS):
        din = EMB if l == 0 else HID
        wz = 0.1 * jax.random.normal(keys[kidx], (K, din, HID), jnp.float32)
        wf = 0.1 * jax.random.normal(keys[kidx + 1], (K, din, HID), jnp.float32)
        bz = 0.05 * jax.random.normal(keys[kidx + 2], (1, HID), jnp.float32)
        bf = 0.05 * jax.random.normal(keys[kidx + 3], (1, HID), jnp.float32)
        kidx += 4
        layers.append(dict(wz=wz, wf=wf, bz=bz, bf=bf))

    w_cls = 0.1 * jax.random.normal(keys[kidx], (HID, VOCAB), jnp.float32)
    b_cls = 0.05 * jax.random.normal(keys[kidx + 1], (1, VOCAB), jnp.float32)

    params = dict(embedding=emb_tbl, layers=layers, w_cls=w_cls, b_cls=b_cls)
    prepped = prepare_params(params, matmul_dtype=jnp.bfloat16)

    inputs = jax.random.randint(keys[kidx + 2], (B, T), 0, VOCAB, jnp.int32)
    lengths = jnp.full((B,), T, jnp.int32)

    out = qrnn_forward(prepped, inputs, lengths)
    out = jax.block_until_ready(out)

    ref = qrnn_forward_ref(params, inputs)
    # bf16 matmul operands (f32 accumulation / recurrence) -> loose tolerance.
    np.testing.assert_allclose(np.asarray(out), np.asarray(ref),
                               rtol=2e-2, atol=2e-2)

    assert out.shape == (B, T, VOCAB)
    print("KERNEL_OK")
</pallas_src>

<mosaic_0001>
module attributes {stable_mosaic.version = 11 : i64} {
  func.func @qrnn_layer_kernel(%arg0: i32, %arg1: memref<1x8x128xbf16, #tpu.memory_space<vmem>>, %arg2: memref<256x256xbf16, #tpu.memory_space<vmem>>, %arg3: memref<1x256xf32, #tpu.memory_space<vmem>>, %arg4: memref<1x8x128xbf16, #tpu.memory_space<vmem>>) attributes {dimension_semantics = [#tpu.dimension_semantics<parallel>], iteration_bounds = array<i64: 2>, scalar_prefetch = 0 : i64, scratch_operands = 0 : i64, tpu.core_type = #tpu.core_type<tc>, window_params = [{transform_indices = @transform_0, window_bounds = array<i64: 1, 8, 128>}, {pipeline_mode = #tpu.pipeline_mode<synchronous>, transform_indices = @transform_1, window_bounds = array<i64: 256, 256>}, {pipeline_mode = #tpu.pipeline_mode<synchronous>, transform_indices = @transform_2, window_bounds = array<i64: 1, 256>}, {transform_indices = @transform_3, window_bounds = array<i64: 1, 8, 128>}]} {
    %c0 = arith.constant 0 : index
    %c0_0 = arith.constant 0 : index
    %c0_1 = arith.constant 0 : index
    %0 = vector.load %arg1[%c0, %c0_0, %c0_1] : memref<1x8x128xbf16, #tpu.memory_space<vmem>>, vector<1x8x128xbf16>
    %cst = arith.constant 0.000000e+00 : bf16
    %1 = vector.broadcast %cst : bf16 to vector<1x1x128xbf16>
    %2 = tpu.concatenate %1, %0 in 1 : vector<1x1x128xbf16>, vector<1x8x128xbf16> -> vector<1x9x128xbf16>
    %3 = vector.extract_strided_slice %2 {offsets = [0, 0, 0], sizes = [1, 8, 128], strides = [1, 1, 1]} : vector<1x9x128xbf16> to vector<1x8x128xbf16>
    %4 = vector.extract_strided_slice %2 {offsets = [0, 1, 0], sizes = [1, 8, 128], strides = [1, 1, 1]} : vector<1x9x128xbf16> to vector<1x8x128xbf16>
    %5 = tpu.concatenate %3, %4 in 2 : vector<1x8x128xbf16>, vector<1x8x128xbf16> -> vector<1x8x256xbf16>
    %6 = vector.shape_cast %5 : vector<1x8x256xbf16> to vector<8x256xbf16>
    %c0_2 = arith.constant 0 : index
    %c0_3 = arith.constant 0 : index
    %7 = vector.load %arg2[%c0_2, %c0_3] : memref<256x256xbf16, #tpu.memory_space<vmem>>, vector<256x256xbf16>
    %cst_4 = arith.constant dense<0.000000e+00> : vector<8x256xf32>
    %8 = tpu.matmul %6, %7, %cst_4 {dimension_numbers = #tpu.dot_dimension_numbers<[1], [0], [0], [1], [0, 0, 1, 1], [], []>} : vector<8x256xbf16>, vector<256x256xbf16>, vector<8x256xf32> -> vector<8x256xf32>
    %c0_5 = arith.constant 0 : index
    %c0_6 = arith.constant 0 : index
    %9 = vector.load %arg3[%c0_5, %c0_6] : memref<1x256xf32, #tpu.memory_space<vmem>>, vector<1x256xf32>
    %10 = vector.broadcast %9 : vector<1x256xf32> to vector<8x256xf32>
    %11 = arith.addf %8, %10 : vector<8x256xf32>
    %12 = vector.extract_strided_slice %11 {offsets = [0, 0], sizes = [8, 128], strides = [1, 1]} : vector<8x256xf32> to vector<8x128xf32>
    %13 = math.tanh %12 : vector<8x128xf32>
    %14 = vector.shape_cast %13 : vector<8x128xf32> to vector<1x8x128xf32>
    %15 = vector.extract_strided_slice %11 {offsets = [0, 128], sizes = [8, 128], strides = [1, 1]} : vector<8x256xf32> to vector<8x128xf32>
    %16 = arith.negf %15 : vector<8x128xf32>
    %17 = math.exp %16 : vector<8x128xf32>
    %cst_7 = arith.constant 1.000000e+00 : f32
    %18 = vector.broadcast %cst_7 : f32 to vector<8x128xf32>
    %19 = arith.addf %18, %17 : vector<8x128xf32>
    %20 = arith.divf %18, %19 : vector<8x128xf32>
    %21 = vector.shape_cast %20 : vector<8x128xf32> to vector<1x8x128xf32>
    %cst_8 = arith.constant 1.000000e+00 : f32
    %22 = vector.broadcast %cst_8 : f32 to vector<1x8x128xf32>
    %23 = arith.subf %22, %21 : vector<1x8x128xf32>
    %24 = arith.mulf %23, %14 : vector<1x8x128xf32>
    %cst_9 = arith.constant 1.000000e+00 : f32
    %25 = vector.broadcast %cst_9 : f32 to vector<1x1x128xf32>
    %26 = vector.extract_strided_slice %21 {offsets = [0, 0, 0], sizes = [1, 7, 128], strides = [1, 1, 1]} : vector<1x8x128xf32> to vector<1x7x128xf32>
    %27 = tpu.concatenate %25, %26 in 1 : vector<1x1x128xf32>, vector<1x7x128xf32> -> vector<1x8x128xf32>
    %cst_10 = arith.constant 0.000000e+00 : f32
    %28 = vector.broadcast %cst_10 : f32 to vector<1x1x128xf32>
    %29 = vector.extract_strided_slice %24 {offsets = [0, 0, 0], sizes = [1, 7, 128], strides = [1, 1, 1]} : vector<1x8x128xf32> to vector<1x7x128xf32>
    %30 = tpu.concatenate %28, %29 in 1 : vector<1x1x128xf32>, vector<1x7x128xf32> -> vector<1x8x128xf32>
    %31 = arith.mulf %21, %30 : vector<1x8x128xf32>
    %32 = arith.addf %31, %24 : vector<1x8x128xf32>
    %33 = arith.mulf %21, %27 : vector<1x8x128xf32>
    %cst_11 = arith.constant 1.000000e+00 : f32
    %34 = vector.broadcast %cst_11 : f32 to vector<1x2x128xf32>
    %35 = vector.extract_strided_slice %33 {offsets = [0, 0, 0], sizes = [1, 6, 128], strides = [1, 1, 1]} : vector<1x8x128xf32> to vector<1x6x128xf32>
    %36 = tpu.concatenate %34, %35 in 1 : vector<1x2x128xf32>, vector<1x6x128xf32> -> vector<1x8x128xf32>
    %cst_12 = arith.constant 0.000000e+00 : f32
    %37 = vector.broadcast %cst_12 : f32 to vector<1x2x128xf32>
    %38 = vector.extract_strided_slice %32 {offsets = [0, 0, 0], sizes = [1, 6, 128], strides = [1, 1, 1]} : vector<1x8x128xf32> to vector<1x6x128xf32>
    %39 = tpu.concatenate %37, %38 in 1 : vector<1x2x128xf32>, vector<1x6x128xf32> -> vector<1x8x128xf32>
    %40 = arith.mulf %33, %39 : vector<1x8x128xf32>
    %41 = arith.addf %40, %32 : vector<1x8x128xf32>
    %42 = arith.mulf %33, %36 : vector<1x8x128xf32>
    %cst_13 = arith.constant 0.000000e+00 : f32
    %43 = vector.broadcast %cst_13 : f32 to vector<1x4x128xf32>
    %44 = vector.extract_strided_slice %41 {offsets = [0, 0, 0], sizes = [1, 4, 128], strides = [1, 1, 1]} : vector<1x8x128xf32> to vector<1x4x128xf32>
    %45 = tpu.concatenate %43, %44 in 1 : vector<1x4x128xf32>, vector<1x4x128xf32> -> vector<1x8x128xf32>
    %46 = arith.mulf %42, %45 : vector<1x8x128xf32>
    %47 = arith.addf %46, %41 : vector<1x8x128xf32>
    %48 = arith.truncf %47 : vector<1x8x128xf32> to vector<1x8x128xbf16>
    %c0_14 = arith.constant 0 : index
    %c0_15 = arith.constant 0 : index
    %c0_16 = arith.constant 0 : index
    %49 = vector.load %arg4[%c0_14, %c0_15, %c0_16] : memref<1x8x128xbf16, #tpu.memory_space<vmem>>, vector<1x8x128xbf16>
    tpu.vector_store %arg4[%c0_14, %c0_15, %c0_16], %48 {strides = array<i32>} : memref<1x8x128xbf16, #tpu.memory_space<vmem>>, vector<1x8x128xbf16>,
    return
  }
  func.func @transform_0(%arg0: i32) -> (i32, i32, i32) {
    %c0_i32 = arith.constant 0 : i32
    %c0_i32_0 = arith.constant 0 : i32
    %c0_i32_1 = arith.constant 0 : i32
    return %arg0, %c0_i32, %c0_i32_0 : i32, i32, i32
  }
  func.func @transform_1(%arg0: i32) -> (i32, i32) {
    %c0_i32 = arith.constant 0 : i32
    %c0_i32_0 = arith.constant 0 : i32
    %c0_i32_1 = arith.constant 0 : i32
    return %c0_i32, %c0_i32_0 : i32, i32
  }
  func.func @transform_2(%arg0: i32) -> (i32, i32) {
    %c0_i32 = arith.constant 0 : i32
    %c0_i32_0 = arith.constant 0 : i32
    %c0_i32_1 = arith.constant 0 : i32
    return %c0_i32, %c0_i32_0 : i32, i32
  }
  func.func @transform_3(%arg0: i32) -> (i32, i32, i32) {
    %c0_i32 = arith.constant 0 : i32
    %c0_i32_0 = arith.constant 0 : i32
    %c0_i32_1 = arith.constant 0 : i32
    return %arg0, %c0_i32, %c0_i32_0 : i32, i32, i32
  }
}

</mosaic_0001>

<bundles_post_ra>
// kernel: tpu_custom_call.1
= control target key start
LH: loop header
LB: loop body
LE: loop exit
PB: predicated region body
PF: predicated region fallthrough
CT: control target
= control target key end

     0   :  { %8 = vsyncpa [#allocation3], 0  ;;  %s1082_s0 = inlined_call_operand.hbm [shape: bf16[2,8,128], index: 0, kind: input, shape index: {}]   ;;  %s1083_s1 = inlined_call_operand.hbm [shape: bf16[256,256], index: 1, kind: input, shape index: {}]   ;;  %s1084_s2 = inlined_call_operand.vmem [shape: f32[1,256], index: 2, kind: input, shape index: {}]   ;;  %s1085_s3 = inlined_call_operand.hbm [shape: bf16[2,8,128], index: 3, kind: output, shape index: {}]  }
   0x1   :  { %10 = vsyncpa [#allocation3 + $0x1], 0 }
   0x2   :  { %11 = vsyncpa [#allocation6], 0 }
   0x3   :  { %12 = vsyncpa [#allocation4], 0 }
   0x4   :  { %14 = vsyncpa [#allocation4 + $0x1], 0  ;;  %s918_s12 = smov 0   ;;  %s920_s13 = smov 0  }
   0x5   :  { %s922_s14 = smov 0   ;;  %s924_s15 = smov 0  }
   0x6 LB: > { %s939_s16 = sadd.s32 4294967295, %s891_s15   ;;  %s607_s17 = sadd.s32 4294967294, %s891_s15   ;;  %s891_s15 = sphi %s924_s15, %s1107_s15   ;;  %s887_s14 = sphi %s922_s14, %s1106_s14   ;;  %s883_s13 = sphi %s920_s13, %s1105_s13   ;;  %s879_s12 = sphi %s918_s12, %s1104_s12  }
   0x7   : > { %p40_p0 = scmp.ne.s32.totalorder %s883_s13, %s879_s12  ;;  %p1086_p1 = scmp.eq.s32.totalorder %s939_s16, 0 }
   0x8   : > { %p112_p3 = scmp.eq.s32.totalorder %s607_s17, 1  ;;  %p608_p5 = scmp.ge.s32.totalorder %s891_s15, 1 }
   0x9   : > { %p948_p4 = por %p1086_p1, %p40_p0  ;;  %p119_p7 = scmp.lt.s32.totalorder %s891_s15, 3 }
   0xa   : > { %p953_p6 = por %p112_p3, %p40_p0  ;;  %s893_s21 = smov [#allocation5]  }
   0xb   : > { %s1090_s18 = scalar_select %p948_p4, 1, 0 }
   0xc   : > { %s1091_s19 = scalar_select %p953_p6, 1, 0 }
   0xd   : > { %p958_p8 = pnand %p608_p5, %p119_p7  ;;  %s131_s22 = sshll.u32 %s893_s21, 4  ;;  %s132_s22 = int_to_ptr.vmem [resolvable:$true] %s131_s22 }
   0xe   : > { %s972_s24 = sadd.s32 1, %s891_s15   ;;  %s27_s25 = sadd.s32 1, %s887_s14 }
   0xf   : > { %s1092_s20 = scalar_select %p958_p8, 1, 0 }
  0x10   : > { %p663_p9 = pneg %p958_p8  ;;  %s24_s26 = ssub.s32 %s891_s15, %s972_s24 }
  0x11   : > { %s780_s27 = scalar_lea.vmem %s132_s22, 4096  ;;  %p788_p5 = scmp.lt.s32.totalorder %s132_s22, %s132_s22 }
  0x12   : > { %p967_p11 = pnand %p663_p9, %p1086_p1  ;;  %p781_p13 = scmp.ne.s32.totalorder %s132_s22, %s780_s27 }
  0x13   : > { %p789_p7 = scmp.lt.s32.totalorder %s780_s27, %s780_s27 }
  0x14   : > { %p771_p12 = pneg %p967_p11 }
  0x15   : > { %p790_p10 = por %p789_p7, %p788_p5 }
  0x16   : > { %p783_p0 = pnand %p781_p13, %p771_p12 }
  0x18   : > { %p784_p3 = pneg %p783_p0 }
  0x1a   : > { %p791_p2 = pnand %p790_p10, %p784_p3 }
  0x1c   : > { %794 = shalt.err (!%p791_p2)
}
  0x1d   : > { %s894_s28 = smov 128   ;;  %s895_s29 = smov 8  }
  0x1e   : > { %666 = dma.hbm_to_vmem [thread:$0]  (!%p967_p11), %s1083_s1, 4096, %s132_s22, [#allocation6], %s894_s28, %s894_s28, %s895_s29  }
  0x1f   : > { %p25_p9 = scmp.eq.s32.totalorder %s24_s26, 0  ;;  %p34_p12 = scmp.ne.s32.totalorder %s887_s14, %s883_s13 }
  0x20   : > { %p35_p10 = scmp.eq.s32.totalorder %s891_s15, 0  ;;  %p676_p2 = scmp.lt.s32.totalorder %s891_s15, 2 }
  0x21   : > { %s989_s5 = scalar_select %p25_p9, %s887_s14, %s27_s25  }
  0x22   : > { %p36_p13 = por %p35_p10, %p34_p12  ;;  %p1094_p0 = scmp.eq.s32.totalorder %s939_s16, 1 }
  0x23   : > { %s148_s7 = sand.u32 1, %s887_s14   ;;  %s612_s8 = sshll.u32 %s891_s15, 6 }
  0x24   : > { %p993_p3 = por %p1094_p0, %p34_p12  ;;  %s611_s9 = sshll.u32 %s148_s7, 2 }
  0x25   : > { %s1002_s17 = scalar_lea.hbm %s1082_s0, %s612_s8  ;;  %s152_s21 = scalar_lea.vmem [#allocation2], %s611_s9 }
  0x26   : > { %s1095_s6 = scalar_select %p993_p3, 1, 0 }
  0x27   : > { %s159_s22 = sshll.u32 %s152_s21, 4  ;;  %p1004_p11 = pnand %p676_p2, %p36_p13  ;;  %s160_s22 = int_to_ptr.vmem [resolvable:$true] %s159_s22 }
  0x28   : > { %s149_s25 = scalar_lea.sflag [#allocation3], %s148_s7  ;;  %s795_s26 = scalar_lea.hbm %s1002_s17, 64 }
  0x29   : > { %p796_p5 = scmp.ne.s32.totalorder %s1002_s17, %s795_s26  ;;  %p797_p7 = pneg %p1004_p11 }
  0x2a   : > { %s800_s29 = scalar_lea.hbm %s1082_s0, 128  ;;  %p801_p10 = scmp.lt.s32.totalorder %s1002_s17, %s1082_s0 }
  0x2b   : > { %p798_p9 = pnand %p797_p7, %p796_p5  ;;  %p802_p2 = scmp.lt.s32.totalorder %s800_s29, %s795_s26 }
  0x2d   : > { %p799_p12 = pneg %p798_p9  ;;  %p803_p13 = por %p802_p2, %p801_p10 }
  0x2f   : > { %p804_p0 = pnand %p803_p13, %p799_p12 }
  0x31   : > { %807 = shalt.err (!%p804_p0)
}
  0x32   : > { %s808_s8 = scalar_lea.vmem %s160_s22, 64  ;;  %s896_s7 = smov [#allocation2]  }
  0x33   : > { %p809_p1 = scmp.ne.s32.totalorder %s160_s22, %s808_s8  ;;  %s813_s9 = sshll.u32 %s896_s7, 4  ;;  %s814_s9 = int_to_ptr.vmem [resolvable:$false] %s813_s9 }
  0x34   : > { %s815_s10 = scalar_lea.vmem %s814_s9, 128  ;;  %p816_p5 = scmp.lt.s32.totalorder %s160_s22, %s814_s9 }
  0x35   : > { %p811_p6 = pnand %p809_p1, %p797_p7  ;;  %p817_p9 = scmp.lt.s32.totalorder %s815_s10, %s808_s8 }
  0x37   : > { %p812_p3 = pneg %p811_p6  ;;  %p818_p4 = por %p817_p9, %p816_p5 }
  0x39   : > { %p819_p8 = pnand %p818_p4, %p812_p3 }
  0x3b   : > { %822 = shalt.err (!%p819_p8)
}
  0x3c   : > { %670 = dma.hbm_to_vmem [thread:$0]  (!%p1004_p11), %s1002_s17, 64, %s160_s22, %s149_s25  }
  0x3d   : > { %p1097_p12 = scmp.ne.s32.totalorder %s1092_s20, 0 }
  0x3e   : > { %s1025_s11 = sand.u32 (!%p1097_p12), 1, %s883_s13   ;;  %p1098_p1 = scmp.ne.s32.totalorder (!%p1097_p12), %s1090_s18, 0 }
  0x3f   : > { %168 = sbr.rel (%p1097_p12) target bundleno = 406 (0x196), region = 32  ;;  %s614_s21 = sshll.u32 (!%p1097_p12), %s1025_s11, 2 }
  0x40   : > { %s171_s26 = scalar_lea.sflag (!%p1097_p12), [#allocation3], %s1025_s11  ;;  %s174_s27 = scalar_lea.vmem (!%p1097_p12), [#allocation2], %s614_s21 }
  0x44   : > { %866 = dma.done.wait (%p1098_p1), %s171_s26, 64  }
  0x45   : > { %868 = vsyncadd (%p1098_p1), %s171_s26, 4294967232  ;;  %p1099_p4 = scmp.eq.s32.totalorder %s939_s16, 0 }
  0x47   : > { %870 = dma.done.wait (%p1099_p4), [#allocation6], 4096   ;;  %p1100_p6 = pmov %p1099_p4 }
  0x48   : > { %v714_v0 = vld [vmem:[#allocation5 + $0x74] ss:$8 sps:$4 sm:$0xff]   ;;  %v716_v1 = vld [vmem:[#allocation5 + $0x70] ss:$8 sps:$4 sm:$0xff]   ;;  %v717_v2 = vld [vmem:[#allocation5 + $0x64] ss:$8 sps:$4 sm:$0xff]   ;;  %v260_v42 = vlaneseq }
  0x49   : > { %872 = vsyncadd (%p1100_p6), [#allocation6], 4294963200  ;;  %430 = vmatprep.subr.bf16.mxu0 %v714_v0  ;;  %v719_v3 = vld [vmem:[#allocation5 + $0x60] ss:$8 sps:$4 sm:$0xff]   ;;  %v720_v4 = vld [vmem:[#allocation5 + $0x54] ss:$8 sps:$4 sm:$0xff]  }
  0x4a   : > { %431 = vmatpush1.bf16.msra.mxu0 %v716_v1  ;;  %v722_v5 = vld [vmem:[#allocation5 + $0x50] ss:$8 sps:$4 sm:$0xff]   ;;  %v723_v6 = vld [vmem:[#allocation5 + $0x44] ss:$8 sps:$4 sm:$0xff]   ;;  %v725_v7 = vld [vmem:[#allocation5 + $0x40] ss:$8 sps:$4 sm:$0xff]  }
  0x4b   : > { %432 = vmatprep.subr.bf16.mxu0 %v717_v2  ;;  %v726_v8 = vld [vmem:[#allocation5 + $0x34] ss:$8 sps:$4 sm:$0xff]   ;;  %v728_v9 = vld [vmem:[#allocation5 + $0x30] ss:$8 sps:$4 sm:$0xff]   ;;  %v729_v10 = vld [vmem:[#allocation5 + $0x24] ss:$8 sps:$4 sm:$0xff]  }
  0x4c   : > { %v731_v11 = vld [vmem:[#allocation5 + $0x20] ss:$8 sps:$4 sm:$0xff]   ;;  %v732_v12 = vld [vmem:[#allocation5 + $0x14] ss:$8 sps:$4 sm:$0xff]   ;;  %vm214_vm0 = vcmask 1040384   ;;  %v261_v43 = vshrl.u32 %v260_v42, 7 }
  0x4d   : > { %v762_v13 = vld [vmem:[%s174_s27] ss:$0 sps:$4 sm:$0xff]   ;;  %vm215_vm1 = vsmask.f32 256  ;;  %v735_v17 = vld [vmem:[#allocation5 + $0x4] ss:$8 sps:$4 sm:$0xff]  }
  0x4e   : > { %433 = vmatpush1.bf16.msra.mxu0 %v719_v3  ;;  %v734_v14 = vld [vmem:[#allocation5 + $0x10] ss:$8 sps:$4 sm:$0xff]   ;;  %v207_v15 = vshrl.u32 %v762_v13, 16  ;;  %v210_v16 = vshll.u32 %v762_v13, 16  ;;  %vm216_vm2 = vmand %vm214_vm0, %vm215_vm1  ;;  %v737_v19 = vld [vmem:[#allocation5] ss:$8 sps:$4 sm:$0xff]  }
  0x4f   : > { %434 = vmatprep.subr.bf16.mxu0 %v720_v4  ;;  %v738_v21 = vld [vmem:[#allocation5 + $0xf4] ss:$8 sps:$4 sm:$0xff]   ;;  %v740_v25 = vld [vmem:[#allocation5 + $0xf0] ss:$8 sps:$4 sm:$0xff]   ;;  %v741_v26 = vld [vmem:[#allocation5 + $0xe4] ss:$8 sps:$4 sm:$0xff]  }
  0x50   : > { %v209_v18 = vrot.slane %v207_v15, 7  ;;  %v743_v29 = vld [vmem:[#allocation5 + $0xe0] ss:$8 sps:$4 sm:$0xff]   ;;  %v744_v30 = vld [vmem:[#allocation5 + $0xd4] ss:$8 sps:$4 sm:$0xff]   ;;  %v266_v44 = vsub.s32 1, %v261_v43 }
  0x51   : > { %v746_v31 = vld [vmem:[#allocation5 + $0xd0] ss:$8 sps:$4 sm:$0xff]   ;;  %v747_v32 = vld [vmem:[#allocation5 + $0xc4] ss:$8 sps:$4 sm:$0xff]   ;;  %v749_v33 = vld [vmem:[#allocation5 + $0xc0] ss:$8 sps:$4 sm:$0xff]  }
  0x52   : > { %435 = vmatpush1.bf16.msra.mxu0 %v722_v5  ;;  %v212_v20 = vor.u32 %v210_v16, %v209_v18  ;;  %v750_v34 = vld [vmem:[#allocation5 + $0xb4] ss:$8 sps:$4 sm:$0xff]   ;;  %v752_v35 = vld [vmem:[#allocation5 + $0xb0] ss:$8 sps:$4 sm:$0xff]   ;;  %v753_v36 = vld [vmem:[#allocation5 + $0xa4] ss:$8 sps:$4 sm:$0xff]  }
  0x53   : > { %436 = vmatprep.subr.bf16.mxu0 %v723_v6  ;;  %v755_v37 = vld [vmem:[#allocation5 + $0xa0] ss:$8 sps:$4 sm:$0xff]   ;;  %v756_v38 = vld [vmem:[#allocation5 + $0x94] ss:$8 sps:$4 sm:$0xff]   ;;  %v758_v39 = vld [vmem:[#allocation5 + $0x90] ss:$8 sps:$4 sm:$0xff]  }
  0x54   : > { %v217_v22 = vsel %vm216_vm2, 0, %v212_v20  ;;  %v759_v40 = vld [vmem:[#allocation5 + $0x84] ss:$8 sps:$4 sm:$0xff]   ;;  %v761_v41 = vld [vmem:[#allocation5 + $0x80] ss:$8 sps:$4 sm:$0xff]   ;;  %v262_v53 = vsub.s32 0, %v261_v43 }
  0x55   : > { %v219_v23 = vshrl.u32 %v217_v22, 16  ;;  %v221_v24 = vshll.u32 %v217_v22, 16  ;;  %v258_v45 = vld [vmem:[%s1084_s2] sm:$0x3]  ;;  %vm495_vm3 = vcmask 1041408   ;;  %vm507_vm4 = vcmask 1043456  }
  0x56   : > { %437 = vmatpush1.bf16.msra.mxu0 %v725_v7  ;;  %v267_v46 = vrot.slane %v258_v45, %v266_v44  ;;  %v263_v54 = vrot.slane %v258_v45, %v262_v53  ;;  %s652_s17 = sshll.u32 %s939_s16, 6  ;;  %s200_s22 = scalar_lea.vmem [#allocation7], %s614_s21 }
  0x57   : > { %438 = vmatprep.subr.bf16.mxu0 %v726_v8  ;;  %v223_v27 = vrot.slane %v221_v24, 1  ;;  %s527_s23 = sshll.u32 %s200_s22, 4  ;;  %s525_s29 = scalar_lea.hbm %s1085_s3, %s652_s17  ;;  %s528_s23 = int_to_ptr.vmem [resolvable:$true] %s527_s23 }
  0x58   : > { %s514_s30 = scalar_lea.sflag [#allocation4], %s1025_s11  ;;  %s823_s4 = scalar_lea.vmem %s528_s23, 64 }
  0x59   : > { %v224_v28 = vor.u32 %v223_v27, %v219_v23  ;;  %p824_p8 = scmp.ne.s32.totalorder %s528_s23, %s823_s4  ;;  %p1101_p3 = scmp.ne.s32.totalorder %s1095_s6, 0 }
  0x5a   : > { %439 = vmatpush1.bf16.msra.mxu0 %v728_v9  ;;  %s897_s8 = smov [#allocation7]  }
  0x5b   : > { %440 = vmatprep.subr.bf16.mxu0 %v729_v10  ;;  %462 = vmatprep.mubr.bf16.mxu0 %v224_v28  ;;  %p825_p11 = pnand %p824_p8, %p1101_p3  ;;  %s827_s7 = sshll.u32 %s897_s8, 4  ;;  %s828_s7 = int_to_ptr.vmem [resolvable:$false] %s827_s7 }
  0x5c   : > { %s829_s16 = scalar_lea.vmem %s828_s7, 128  ;;  %p830_p10 = scmp.lt.s32.totalorder %s528_s23, %s828_s7 }
  0x5d   : > { %p826_p7 = pneg %p825_p11  ;;  %p831_p2 = scmp.lt.s32.totalorder %s829_s16, %s823_s4 }
  0x5e   : > { %441 = vmatpush1.bf16.msra.mxu0 %v731_v11 }
  0x5f   : > { %442 = vmatprep.subr.bf16.mxu0 %v732_v12  ;;  %p832_p13 = por %p831_p2, %p830_p10 }
  0x61   : > { %p833_p0 = pnand %p832_p13, %p826_p7 }
  0x62   : > { %443 = vmatpush1.bf16.msra.mxu0 %v734_v14 }
  0x63   : > { %444 = vmatprep.subr.bf16.mxu0 %v735_v17 }
  0x66   : > { %445 = vmatpush1.bf16.msra.mxu0 %v737_v19 }
  0x67   : > { %446 = vmatprep.subr.bf16.mxu0 %v738_v21 }
  0x6a   : > { %447 = vmatpush2.bf16.msra.mxu0 %v740_v25 }
  0x6b   : > { %448 = vmatprep.subr.bf16.mxu0 %v741_v26 }
  0x6e   : > { %449 = vmatpush2.bf16.msra.mxu0 %v743_v29 }
  0x6f   : > { %450 = vmatprep.subr.bf16.mxu0 %v744_v30 }
  0x72   : > { %451 = vmatpush2.bf16.msra.mxu0 %v746_v31 }
  0x73   : > { %452 = vmatprep.subr.bf16.mxu0 %v747_v32 }
  0x76   : > { %453 = vmatpush2.bf16.msra.mxu0 %v749_v33 }
  0x77   : > { %454 = vmatprep.subr.bf16.mxu0 %v750_v34 }
  0x7a   : > { %455 = vmatpush2.bf16.msra.mxu0 %v752_v35 }
  0x7b   : > { %456 = vmatprep.subr.bf16.mxu0 %v753_v36 }
  0x7e   : > { %457 = vmatpush2.bf16.msra.mxu0 %v755_v37 }
  0x7f   : > { %458 = vmatprep.subr.bf16.mxu0 %v756_v38 }
  0x82   : > { %459 = vmatpush2.bf16.msra.mxu0 %v758_v39 }
  0x83   : > { %460 = vmatprep.subr.bf16.mxu0 %v759_v40 }
  0x86   : > { %461 = vmatpush2.bf16.msra.mxu0 %v761_v41 }
  0x89   : > { %463 = vmatmul.mubr.bf16.vlgmr.msra.gmra.mxu0 %v217_v22 }
 0x149   : > { %v464_v47 = vpop.f32.mrf.mxu0 }
 0x14a   : > { %v465_v56 = vadd.f32 %v464_v47, %v263_v54 }
 0x14b   : > { %v466_v48 = vpop.f32.mrf.mxu0 }
 0x14c   : > { %v467_v49 = vadd.f32 %v466_v48, %v267_v46 }
 0x14d   : > { %v468_v50 = vpop.f32.mrf.mxu0 }
 0x14e   : > { %v650_v51 = vmul.f32 -1.442695, %v467_v49 }
 0x14f   : > { %v469_v52 = vpop.f32.mrf.mxu0 }
 0x150   : > { %763 = vpow2.f32 %v650_v51 }
 0x15d   : > { %v764_v55 = vpop.eup %763 }
 0x15e   : > { %v475_v57 = vadd.f32 1.0, %v764_v55 }
 0x160   : > { %765 = vrcp.f32 %v475_v57 }
 0x161   : > { %767 = vtanh.f32 %v465_v56 }
 0x16d   : > { %v766_v58 = vpop.eup %765 }
 0x16e   : > { %v478_v59 = vsub.f32 1.0, %v766_v58  ;;  %v768_v60 = vpop.eup %767  ;;  %v481_v61 = vrot.slane %v766_v58, 7 }
 0x170   : > { %v479_v62 = vmul.f32 %v768_v60, %v478_v59  ;;  %v484_v0 = vsel %vm214_vm0, 1.0, %v481_v61 }
 0x171   : > { %v491_v3 = vmul.f32 %v766_v58, %v484_v0 }
 0x172   : > { %v486_v63 = vrot.slane %v479_v62, 7 }
 0x173   : > { %v493_v6 = vrot.slane %v491_v3, 6 }
 0x174   : > { %v488_v1 = vsel %vm214_vm0, 0.0, %v486_v63 }
 0x175   : > { %v489_v2 = vmul.f32 %v766_v58, %v488_v1  ;;  %v496_v9 = vsel %vm495_vm3, 1.0, %v493_v6 }
 0x176   : > { %v503_v12 = vmul.f32 %v496_v9, %v491_v3 }
 0x177   : > { %v490_v4 = vadd.f32 %v489_v2, %v479_v62 }
 0x179   : > { %v498_v5 = vrot.slane %v490_v4, 6 }
 0x17b   : > { %v500_v7 = vsel %vm495_vm3, 0.0, %v498_v5 }
 0x17c   : > { %v501_v8 = vmul.f32 %v500_v7, %v491_v3 }
 0x17e   : > { %v502_v10 = vadd.f32 %v501_v8, %v490_v4 }
 0x180   : > { %v505_v11 = vrot.slane %v502_v10, 4 }
 0x182   : > { %v508_v13 = vsel %vm507_vm4, 0.0, %v505_v11 }
 0x183   : > { %v509_v14 = vmul.f32 %v508_v13, %v503_v12 }
 0x185   : > { %v510_v15 = vadd.f32 %v509_v14, %v502_v10 }
 0x187   : > { %v511_v16 = vpack.c.bf16 %v510_v15, %v510_v15 }
 0x189   : > { %512 = vst [vmem:[%s200_s22] sm:$0xf] %v511_v16 }
 0x18a   : > { %836 = shalt.err (!%p833_p0)
}
 0x18b   : > { %s837_s9 = scalar_lea.hbm %s525_s29, 64  ;;  %s841_s21 = scalar_lea.hbm %s1085_s3, 128 }
 0x18c   : > { %p838_p5 = scmp.ne.s32.totalorder %s525_s29, %s837_s9  ;;  %p842_p1 = scmp.lt.s32.totalorder %s525_s29, %s1085_s3 }
 0x18d   : > { %p843_p4 = scmp.lt.s32.totalorder %s841_s21, %s837_s9 }
 0x18e   : > { %p839_p9 = pnand %p838_p5, %p1101_p3 }
 0x18f   : > { %p844_p6 = por %p843_p4, %p842_p1 }
 0x190   : > { %p840_p12 = pneg %p839_p9 }
 0x192   : > { %p845_p8 = pnand %p844_p6, %p840_p12 }
 0x194   : > { %848 = shalt.err (!%p845_p8)
}
 0x195   : > { %661 = dma.vmem_to_hbm [thread:$0]  (%p1101_p3), %s528_s23, 64, %s525_s29, %s514_s30  }
 0x196 PF: > { %s539_s18 = sand.u32 1, %s879_s12   ;;  %p1102_p11 = scmp.ne.s32.totalorder %s1091_s19, 0 }
 0x197   : > { %p1103_p7 = scmp.ge.s32.totalorder %s891_s15, 2  ;;  %s540_s20 = scalar_lea.sflag [#allocation4], %s539_s18 }
 0x199   : > { %p672_p10 = pnand %p1103_p7, %p1102_p11 }
 0x19b   : > { %p673_p2 = pneg %p672_p10 }
 0x19d   : > { %874 = dma.done.wait (%p673_p2), %s540_s20, 64  }
 0x19e   : > { %876 = vsyncadd (%p673_p2), %s540_s20, 4294967232  ;;  %p17_p13 = scmp.ge.s32.totalorder %s972_s24, 4   ;;  %s1104_s12 = smov %s883_s13 }
 0x19f   : > { %s1105_s13 = smov %s887_s14  ;;  %s1106_s14 = smov %s989_s5 }
 0x1a0   : > { %s1107_s15 = smov %s972_s24  ;;  %19 = sbr.rel (!%p17_p13) target bundleno = 6 (0x6), region = 81 }
 0x1a5   :  { %545 = vsyncpa [#allocation3], 1 }
 0x1a6   :  { %547 = vsyncpa [#allocation3 + $0x1], 1 }
 0x1a7   :  { %548 = vsyncpa [#allocation6], 1 }
 0x1a8   :  { %549 = vsyncpa [#allocation4], 1 }
 0x1a9   :  { %551 = vsyncpa [#allocation4 + $0x1], 1 }

</bundles_post_ra>
